<compile_context>
chip_gen: v6e
topology: v6e:2x2x1
jax: 0.10.0
libtpu: 0.0.40
codegen_flags: <defaults>
</compile_context>

<pallas_src>
import jax
import jax.numpy as jnp
from jax.experimental import pallas as pl
from jax.experimental.pallas import tpu as pltpu


def actor_mlp_kernel(x_ref, w1_ref, b1_ref, w2_ref, b2_ref, w3_ref, b3_ref, o_ref):
    # Layer 1: Linear + ReLU (f32 MXU accumulation)
    h1 = jnp.dot(x_ref[...], w1_ref[...], preferred_element_type=jnp.float32)
    h1 = jnp.maximum(h1 + b1_ref[...], 0.0)          # (TB, H) + (1, H) broadcast

    # Layer 2: Linear + ReLU
    h2 = jnp.dot(h1, w2_ref[...], preferred_element_type=jnp.float32)
    h2 = jnp.maximum(h2 + b2_ref[...], 0.0)

    # Layer 3: Linear + tanh (tanh goes to the EUP, free under the MXU)
    h3 = jnp.dot(h2, w3_ref[...], preferred_element_type=jnp.float32)
    o_ref[...] = jnp.tanh(h3 + b3_ref[...]).astype(o_ref.dtype)


def _round_up(x, m):
    return ((x + m - 1) // m) * m


def actor_forward(state, params, *, max_tile_b=512):
    """state: (B, input_size) f32; params: dict of w1,b1,w2,b2,w3,b3 (f32).

    Tiles the batch dimension so weights stay VMEM-resident while per-tile
    state/output DMAs overlap compute. Batch is padded to a multiple of the
    tile size and the padding rows are sliced off at the end.
    """
    w1, b1, w2, b2, w3, b3 = (params[k] for k in ("w1", "b1", "w2", "b2", "w3", "b3"))
    B, in_size = state.shape
    out_size = w3.shape[1]

    # Batch tile: multiple of 8 (f32 sublane group), capped for VMEM friendliness.
    tile_b = min(max_tile_b, _round_up(B, 8))
    b_pad = _round_up(B, tile_b)
    if b_pad != B:
        state = jnp.pad(state, ((0, b_pad - B), (0, 0)))

    grid = (pl.cdiv(b_pad, tile_b),)

    # Weights / biases: full-array blocks, constant index_map -> resident in VMEM.
    resident = lambda a: pl.BlockSpec(a.shape, lambda i: (0,) * a.ndim)

    out = pl.pallas_call(
        actor_mlp_kernel,
        out_shape=jax.ShapeDtypeStruct((b_pad, out_size), jnp.float32),
        grid=grid,
        in_specs=[
            pl.BlockSpec((tile_b, in_size), lambda i: (i, 0)),   # state tile (pipelined)
            resident(w1), resident(b1),
            resident(w2), resident(b2),
            resident(w3), resident(b3),
        ],
        out_specs=pl.BlockSpec((tile_b, out_size), lambda i: (i, 0)),
        compiler_params=pltpu.CompilerParams(
            dimension_semantics=("parallel",),                   # v7x: shard batch over 2 TCs
        ),
    )(state, w1, b1, w2, b2, w3, b3)

    return out[:B]


def init_actor_params(key, input_size, hidden_size, output_size):
    """Deterministic init mimicking PyTorch nn.Linear default (uniform +/- 1/sqrt(fan_in)).
    Weights stored as (in_features, out_features)."""
    ks = jax.random.split(key, 6)

    def lin(kw, kb, fan_in, fan_out):
        bound = 1.0 / jnp.sqrt(jnp.float32(fan_in))
        w = jax.random.uniform(kw, (fan_in, fan_out), jnp.float32, -bound, bound)
        b = jax.random.uniform(kb, (1, fan_out), jnp.float32, -bound, bound)
        return w, b

    w1, b1 = lin(ks[0], ks[1], input_size, hidden_size)
    w2, b2 = lin(ks[2], ks[3], hidden_size, hidden_size)
    w3, b3 = lin(ks[4], ks[5], hidden_size, output_size)
    return {"w1": w1, "b1": b1, "w2": w2, "b2": b2, "w3": w3, "b3": b3}


def actor_forward_ref(state, p):
    h = jnp.maximum(state @ p["w1"] + p["b1"], 0.0)
    h = jnp.maximum(h @ p["w2"] + p["b2"], 0.0)
    return jnp.tanh(h @ p["w3"] + p["b3"])


if __name__ == "__main__":
    key = jax.random.PRNGKey(0)
    k_params, k_state, k_state2 = jax.random.split(key, 3)

    input_size = 16   # robot-arm observation dim
    hidden_size = 32
    output_size = 8   # action dim

    params = init_actor_params(k_params, input_size, hidden_size, output_size)

    # Small rollout-style batch (padded to one 8-row tile inside the wrapper).
    batch = 2
    state = jax.random.normal(k_state, (batch, input_size), jnp.float32)
    out = jax.block_until_ready(actor_forward(state, params))
    ref = actor_forward_ref(state, params)
    assert out.shape == (batch, output_size)
    assert jnp.allclose(out, ref, atol=1e-5, rtol=1e-5)

    # Larger, non-tile-aligned batch exercising the batched grid + padding path.
    batch2 = 300
    state2 = jax.random.normal(k_state2, (batch2, input_size), jnp.float32)
    out2 = jax.block_until_ready(actor_forward(state2, params, max_tile_b=128))
    ref2 = actor_forward_ref(state2, params)
    assert out2.shape == (batch2, output_size)
    assert jnp.allclose(out2, ref2, atol=1e-5, rtol=1e-5)

    print("KERNEL_OK")
</pallas_src>

<mosaic_0001>
module attributes {stable_mosaic.version = 11 : i64} {
  func.func @actor_mlp_kernel(%arg0: i32, %arg1: memref<8x16xf32, #tpu.memory_space<vmem>>, %arg2: memref<16x32xf32, #tpu.memory_space<vmem>>, %arg3: memref<1x32xf32, #tpu.memory_space<vmem>>, %arg4: memref<32x32xf32, #tpu.memory_space<vmem>>, %arg5: memref<1x32xf32, #tpu.memory_space<vmem>>, %arg6: memref<32x8xf32, #tpu.memory_space<vmem>>, %arg7: memref<1x8xf32, #tpu.memory_space<vmem>>, %arg8: memref<8x8xf32, #tpu.memory_space<vmem>>) attributes {dimension_semantics = [#tpu.dimension_semantics<parallel>], iteration_bounds = array<i64: 1>, scalar_prefetch = 0 : i64, scratch_operands = 0 : i64, tpu.core_type = #tpu.core_type<tc>, window_params = [{transform_indices = @transform_0, window_bounds = array<i64: 8, 16>}, {pipeline_mode = #tpu.pipeline_mode<synchronous>, transform_indices = @transform_1, window_bounds = array<i64: 16, 32>}, {pipeline_mode = #tpu.pipeline_mode<synchronous>, transform_indices = @transform_2, window_bounds = array<i64: 1, 32>}, {pipeline_mode = #tpu.pipeline_mode<synchronous>, transform_indices = @transform_3, window_bounds = array<i64: 32, 32>}, {pipeline_mode = #tpu.pipeline_mode<synchronous>, transform_indices = @transform_4, window_bounds = array<i64: 1, 32>}, {pipeline_mode = #tpu.pipeline_mode<synchronous>, transform_indices = @transform_5, window_bounds = array<i64: 32, 8>}, {pipeline_mode = #tpu.pipeline_mode<synchronous>, transform_indices = @transform_6, window_bounds = array<i64: 1, 8>}, {transform_indices = @transform_7, window_bounds = array<i64: 8, 8>}]} {
    %c0 = arith.constant 0 : index
    %c0_0 = arith.constant 0 : index
    %0 = vector.load %arg1[%c0, %c0_0] : memref<8x16xf32, #tpu.memory_space<vmem>>, vector<8x16xf32>
    %c0_1 = arith.constant 0 : index
    %c0_2 = arith.constant 0 : index
    %1 = vector.load %arg2[%c0_1, %c0_2] : memref<16x32xf32, #tpu.memory_space<vmem>>, vector<16x32xf32>
    %cst = arith.constant dense<0.000000e+00> : vector<8x32xf32>
    %2 = tpu.matmul %0, %1, %cst {dimension_numbers = #tpu.dot_dimension_numbers<[1], [0], [0], [1], [0, 0, 1, 1], [], []>} : vector<8x16xf32>, vector<16x32xf32>, vector<8x32xf32> -> vector<8x32xf32>
    %c0_3 = arith.constant 0 : index
    %c0_4 = arith.constant 0 : index
    %3 = vector.load %arg3[%c0_3, %c0_4] : memref<1x32xf32, #tpu.memory_space<vmem>>, vector<1x32xf32>
    %4 = vector.broadcast %3 : vector<1x32xf32> to vector<8x32xf32>
    %5 = arith.addf %2, %4 : vector<8x32xf32>
    %cst_5 = arith.constant 0.000000e+00 : f32
    %6 = vector.broadcast %cst_5 : f32 to vector<8x32xf32>
    %7 = arith.maximumf %5, %6 : vector<8x32xf32>
    %c0_6 = arith.constant 0 : index
    %c0_7 = arith.constant 0 : index
    %8 = vector.load %arg4[%c0_6, %c0_7] : memref<32x32xf32, #tpu.memory_space<vmem>>, vector<32x32xf32>
    %cst_8 = arith.constant dense<0.000000e+00> : vector<8x32xf32>
    %9 = tpu.matmul %7, %8, %cst_8 {dimension_numbers = #tpu.dot_dimension_numbers<[1], [0], [0], [1], [0, 0, 1, 1], [], []>} : vector<8x32xf32>, vector<32x32xf32>, vector<8x32xf32> -> vector<8x32xf32>
    %c0_9 = arith.constant 0 : index
    %c0_10 = arith.constant 0 : index
    %10 = vector.load %arg5[%c0_9, %c0_10] : memref<1x32xf32, #tpu.memory_space<vmem>>, vector<1x32xf32>
    %11 = vector.broadcast %10 : vector<1x32xf32> to vector<8x32xf32>
    %12 = arith.addf %9, %11 : vector<8x32xf32>
    %cst_11 = arith.constant 0.000000e+00 : f32
    %13 = vector.broadcast %cst_11 : f32 to vector<8x32xf32>
    %14 = arith.maximumf %12, %13 : vector<8x32xf32>
    %c0_12 = arith.constant 0 : index
    %c0_13 = arith.constant 0 : index
    %15 = vector.load %arg6[%c0_12, %c0_13] : memref<32x8xf32, #tpu.memory_space<vmem>>, vector<32x8xf32>
    %cst_14 = arith.constant dense<0.000000e+00> : vector<8x8xf32>
    %16 = tpu.matmul %14, %15, %cst_14 {dimension_numbers = #tpu.dot_dimension_numbers<[1], [0], [0], [1], [0, 0, 1, 1], [], []>} : vector<8x32xf32>, vector<32x8xf32>, vector<8x8xf32> -> vector<8x8xf32>
    %c0_15 = arith.constant 0 : index
    %c0_16 = arith.constant 0 : index
    %17 = vector.load %arg7[%c0_15, %c0_16] : memref<1x8xf32, #tpu.memory_space<vmem>>, vector<1x8xf32>
    %18 = vector.broadcast %17 : vector<1x8xf32> to vector<8x8xf32>
    %19 = arith.addf %16, %18 : vector<8x8xf32>
    %20 = math.tanh %19 : vector<8x8xf32>
    %c0_17 = arith.constant 0 : index
    %c0_18 = arith.constant 0 : index
    %21 = vector.load %arg8[%c0_17, %c0_18] : memref<8x8xf32, #tpu.memory_space<vmem>>, vector<8x8xf32>
    tpu.vector_store %arg8[%c0_17, %c0_18], %20 {strides = array<i32>} : memref<8x8xf32, #tpu.memory_space<vmem>>, vector<8x8xf32>,
    return
  }
  func.func @transform_0(%arg0: i32) -> (i32, i32) {
    %c0_i32 = arith.constant 0 : i32
    %c0_i32_0 = arith.constant 0 : i32
    return %arg0, %c0_i32 : i32, i32
  }
  func.func @transform_1(%arg0: i32) -> (i32, i32) {
    %c0_i32 = arith.constant 0 : i32
    %c0_i32_0 = arith.constant 0 : i32
    %c0_i32_1 = arith.constant 0 : i32
    return %c0_i32, %c0_i32_0 : i32, i32
  }
  func.func @transform_2(%arg0: i32) -> (i32, i32) {
    %c0_i32 = arith.constant 0 : i32
    %c0_i32_0 = arith.constant 0 : i32
    %c0_i32_1 = arith.constant 0 : i32
    return %c0_i32, %c0_i32_0 : i32, i32
  }
  func.func @transform_3(%arg0: i32) -> (i32, i32) {
    %c0_i32 = arith.constant 0 : i32
    %c0_i32_0 = arith.constant 0 : i32
    %c0_i32_1 = arith.constant 0 : i32
    return %c0_i32, %c0_i32_0 : i32, i32
  }
  func.func @transform_4(%arg0: i32) -> (i32, i32) {
    %c0_i32 = arith.constant 0 : i32
    %c0_i32_0 = arith.constant 0 : i32
    %c0_i32_1 = arith.constant 0 : i32
    return %c0_i32, %c0_i32_0 : i32, i32
  }
  func.func @transform_5(%arg0: i32) -> (i32, i32) {
    %c0_i32 = arith.constant 0 : i32
    %c0_i32_0 = arith.constant 0 : i32
    %c0_i32_1 = arith.constant 0 : i32
    return %c0_i32, %c0_i32_0 : i32, i32
  }
  func.func @transform_6(%arg0: i32) -> (i32, i32) {
    %c0_i32 = arith.constant 0 : i32
    %c0_i32_0 = arith.constant 0 : i32
    %c0_i32_1 = arith.constant 0 : i32
    return %c0_i32, %c0_i32_0 : i32, i32
  }
  func.func @transform_7(%arg0: i32) -> (i32, i32) {
    %c0_i32 = arith.constant 0 : i32
    %c0_i32_0 = arith.constant 0 : i32
    return %arg0, %c0_i32 : i32, i32
  }
}

</mosaic_0001>

<bundles_post_ra>
// kernel: tpu_custom_call.1
= control target key start
LH: loop header
LB: loop body
LE: loop exit
PB: predicated region body
PF: predicated region fallthrough
CT: control target
= control target key end

     0   :  { %12 = vsyncpa [#allocation3], 0  ;;  %s544_s0 = inlined_call_operand.vmem [shape: f32[8,16], index: 0, kind: input, shape index: {}]   ;;  %s545_s1 = inlined_call_operand.hbm [shape: f32[16,32], index: 1, kind: input, shape index: {}]   ;;  %s546_s2 = inlined_call_operand.vmem [shape: f32[1,32], index: 2, kind: input, shape index: {}]   ;;  %s547_s3 = inlined_call_operand.vmem [shape: f32[32,32], index: 3, kind: input, shape index: {}]   ;;  %s548_s4 = inlined_call_operand.hbm [shape: f32[1,32], index: 4, kind: input, shape index: {}]   ;;  %s549_s5 = inlined_call_operand.vmem [shape: f32[32,8], index: 5, kind: input, shape index: {}]   ;;  %s550_s6 = inlined_call_operand.vmem [shape: f32[1,8], index: 6, kind: input, shape index: {}]   ;;  %s551_s7 = inlined_call_operand.hbm [shape: f32[8,8], index: 7, kind: output, shape index: {}]  }
   0x1   :  { %13 = vsyncpa [#allocation6], 0 }
   0x2   :  { %14 = vsyncpa [#allocation4], 0  ;;  %s450_s24 = smov [#allocation2]  }
   0x3   :  { %s22_s25 = sshll.u32 %s450_s24, 4  ;;  %s23_s25 = int_to_ptr.vmem [resolvable:$true] %s22_s25 }
   0x4   :  { %s392_s26 = scalar_lea.vmem %s23_s25, 256  ;;  %p397_p1 = scmp.lt.s32.totalorder %s23_s25, %s23_s25 }
   0x5   :  { %p393_p0 = scmp.ne.s32.totalorder %s23_s25, %s392_s26  ;;  %p398_p2 = scmp.lt.s32.totalorder %s392_s26, %s392_s26 }
   0x7   :  { %p399_p3 = por %p398_p2, %p397_p1 }
   0x9   :  { %p400_p4 = pnand %p399_p3, %p393_p0 }
   0xb   :  { %403 = shalt.err (!%p400_p4)
}
   0xc   :  { %s451_s27 = smov 128   ;;  %s452_s28 = smov 8  }
   0xd   :  { %28 = dma.hbm_to_vmem [thread:$0]  %s545_s1, 256, %s23_s25, [#allocation3], %s451_s27, %s451_s27, %s452_s28  }
   0xe   :  { %s453_s8 = smov [#allocation5]  }
   0xf   :  { %s39_s9 = sshll.u32 %s453_s8, 4  ;;  %s40_s9 = int_to_ptr.vmem [resolvable:$true] %s39_s9 }
  0x10   :  { %s412_s10 = scalar_lea.vmem %s40_s9, 16  ;;  %s416_s11 = scalar_lea.vmem %s40_s9, 32 }
  0x11   :  { %p413_p5 = scmp.ne.s32.totalorder %s40_s9, %s412_s10  ;;  %p417_p6 = scmp.lt.s32.totalorder %s40_s9, %s40_s9 }
  0x12   :  { %p418_p7 = scmp.lt.s32.totalorder %s416_s11, %s412_s10 }
  0x14   :  { %p419_p8 = por %p418_p7, %p417_p6 }
  0x16   :  { %p420_p9 = pnand %p419_p8, %p413_p5 }
  0x18   :  { %423 = shalt.err (!%p420_p9)
}
  0x19   :  { %42 = dma.hbm_to_vmem [thread:$0]  %s548_s4, 16, %s40_s9, [#allocation6]  }
  0x1a   :  { %444 = dma.done.wait [#allocation3], 256  }
  0x1b   :  { %445 = vsyncadd [#allocation3], 4294967040 }
  0x1c   :  { %446 = dma.done.wait [#allocation6], 16  }
  0x1d   :  { %447 = vsyncadd [#allocation6], 4294967280  ;;  %v454_v0 = vmov 0.0   ;;  %vm455_vm0 = vmmov 0   ;;  %v55_v1 = vld [vmem:[#allocation2 + $0x8] sm:$0xff]  ;;  %v54_v2 = vld [vmem:[#allocation2] sm:$0xff] }
  0x1e   :  { %346 = vmatprep.subr.mxu0 %v454_v0  ;;  %350 = vmatprep.mubr.msk.f32.mxu0 %vm455_vm0, %v454_v0  ;;  %v53_v3 = vld [vmem:[%s544_s0] sm:$0xff]  ;;  %vm63_vm1 = vcmask 130048   ;;  %v141_v4 = vld [vmem:[%s547_s3 + $0x18] sm:$0xff]  ;;  %v140_v5 = vld [vmem:[%s547_s3 + $0x10] sm:$0xff]  ;;  %vm149_vm2 = vcmask 261120   ;;  %s456_s8 = smov [#allocation7]  }
  0x1f   :  { %353 = vmatprep.subr.mxu1 %v454_v0  ;;  %361 = vmatprep.mubr.msk.f32.mxu1 %vm455_vm0, %v454_v0  ;;  %v139_v6 = vld [vmem:[%s547_s3 + $0x8] sm:$0xff]  ;;  %v138_v7 = vld [vmem:[%s547_s3] sm:$0xff]  ;;  %v227_v8 = vld [vmem:[%s549_s5 + $0x18] sm:$0xff]  ;;  %s317_s9 = sshll.u32 %s456_s8, 4  ;;  %vm309_vm3 = vcmask 64512   ;;  %s318_s9 = int_to_ptr.vmem [resolvable:$true] %s317_s9 }
  0x20   :  { %347 = vmatpush3.msra.mxu0 %v55_v1  ;;  %354 = vmatpush3.msra.mxu1 %v141_v4  ;;  %v327_v9 = vld [vmem:[%s546_s2] ss:$0 sm:$0xff]  ;;  %v226_v14 = vld [vmem:[%s549_s5 + $0x10] sm:$0xff]  ;;  %v225_v15 = vld [vmem:[%s549_s5 + $0x8] sm:$0xff]  ;;  %p429_p11 = scmp.lt.s32.totalorder %s318_s9, %s318_s9 }
  0x21   :  { %348 = vmatprep.subr.mxu0 %v454_v0  ;;  %355 = vmatprep.subr.mxu1 %v454_v0  ;;  %v224_v16 = vld [vmem:[%s549_s5] sm:$0xff]  ;;  %v329_v17 = vld [vmem:[#allocation5] ss:$0 sm:$0xff]  ;;  %s424_s5 = scalar_lea.vmem %s318_s9, 128 }
  0x22   :  { %349 = vmatpush3.msra.mxu0 %v54_v2  ;;  %356 = vmatpush3.msra.mxu1 %v140_v5  ;;  %v331_v22 = vld [vmem:[%s550_s6] ss:$0 sm:$0xff]  ;;  %p425_p10 = scmp.ne.s32.totalorder %s318_s9, %s424_s5  ;;  %p430_p12 = scmp.lt.s32.totalorder %s424_s5, %s424_s5 }
  0x23   :  { %351 = vmatmul.mubr.msk.f32.vlgmr.msra.gmra.mxu0 %vm63_vm1, %v53_v3  ;;  %364 = vmatprep.subr.mxu0 %v454_v0 }
  0x24   :  { %372 = vmatprep.mubr.msk.f32.mxu0 %vm455_vm0, %v454_v0  ;;  %357 = vmatprep.subr.mxu1 %v454_v0  ;;  %p431_p13 = por %p430_p12, %p429_p11 }
  0x25   :  { %358 = vmatpush3.msra.mxu1 %v139_v6  ;;  %365 = vmatpush3.msra.mxu0 %v227_v8 }
  0x26   :  { %359 = vmatprep.subr.mxu1 %v454_v0  ;;  %366 = vmatprep.subr.mxu0 %v454_v0  ;;  %p432_p0 = pnand %p431_p13, %p425_p10 }
  0x27   :  { %360 = vmatpush3.msra.mxu1 %v138_v7  ;;  %367 = vmatpush3.msra.mxu0 %v226_v14 }
  0x28   :  { %368 = vmatprep.subr.mxu0 %v454_v0 }
  0x29   :  { %369 = vmatpush3.msra.mxu0 %v225_v15 }
  0x2a   :  { %370 = vmatprep.subr.mxu0 %v454_v0 }
  0x2b   :  { %371 = vmatpush3.msra.mxu0 %v224_v16 }
  0xe3   :  { %v133_v10 = vpop.f32.mrf.mxu0 }
  0xe4   :  { %v134_v11 = vadd.f32 %v327_v9, %v133_v10 }
  0xe5   :  { %v352_v12 = vpop.f32.mrf.mxu0 }
  0xe6   :  { %v137_v13 = vmax.f32 %v134_v11, 0.0 }
  0xe8   :  { %362 = vmatmul.mubr.msk.f32.vlgmr.msra.gmra.mxu1 %vm149_vm2, %v137_v13 }
 0x1a8   :  { %v219_v18 = vpop.f32.mrf.mxu1 }
 0x1a9   :  { %v220_v19 = vadd.f32 %v329_v17, %v219_v18 }
 0x1aa   :  { %v363_v20 = vpop.f32.mrf.mxu1 }
 0x1ab   :  { %v223_v21 = vmax.f32 %v220_v19, 0.0 }
 0x1ad   :  { %373 = vmatmul.mubr.msk.f32.vlgmr.msra.gmra.mxu0 %vm149_vm2, %v223_v21 }
 0x26d   :  { %v304_v23 = vpop.f32.mrf.mxu0 }
 0x26e   :  { %v305_v24 = vadd.f32 %v331_v22, %v304_v23 }
 0x26f   :  { %v374_v25 = vpop.f32.mrf.mxu0 }
 0x270   :  { %382 = vtanh.f32 %v305_v24 }
 0x27d   :  { %v383_v26 = vpop.eup %382 }
 0x27e   :  { %310 = vst.msk [vmem:[#allocation7] sm:$0xff] %vm309_vm3, %v383_v26 }
 0x27f   :  { %435 = shalt.err (!%p432_p0)
}
 0x280   :  { %320 = dma.vmem_to_hbm [thread:$0]  %s318_s9, 128, %s551_s7, [#allocation4]  }
 0x281   :  { %448 = dma.done.wait [#allocation4], 128  }
 0x282   :  { %449 = vsyncadd [#allocation4], 4294967168 }
 0x283   :  { %324 = vsyncpa [#allocation3], 1 }
 0x284   :  { %325 = vsyncpa [#allocation6], 1 }
 0x285   :  { %326 = vsyncpa [#allocation4], 1 }

</bundles_post_ra>
